<compile_context>
chip_gen: v5e
topology: v5e:2x2
jax: 0.10.0
libtpu: 0.0.40
codegen_flags: <defaults>
</compile_context>

<pallas_src>
import functools
import math

import jax
import jax.numpy as jnp
from jax.experimental import pallas as pl
from jax.experimental.pallas import tpu as pltpu

LN_EPS = 1e-5


def _critics_kernel(E, H, x_ref, w1_ref, w2_ref, w3_ref, c_ref, o_ref):
    # x_ref : (bt, E*Din)   bf16  lane-packed [obs, action] per ensemble member
    # w1_ref: (E*Din, E*H)  bf16  block-diagonal trunk weight
    # w2_ref: (E*H, E*H)    bf16  block-diagonal Q hidden weight
    # w3_ref: (E*H, E)      bf16  block-diagonal Q head weight
    # c_ref : (5, E*H)      f32   rows: b1 | ln_w | ln_b | b2 | b3 (first E lanes)
    # o_ref : (bt, E)       f32   Q values, batch on sublanes / members on lanes
    f32 = jnp.float32

    b1 = c_ref[0:1, :]
    ln_w = c_ref[1:2, :]
    ln_b = c_ref[2:3, :]
    b2 = c_ref[3:4, :]
    b3 = c_ref[4:5, 0:E]

    # Trunk linear: one MXU pass for the whole ensemble (block-diagonal weight).
    h = jnp.dot(x_ref[...], w1_ref[...], preferred_element_type=f32) + b1

    # Per-member LayerNorm over each H-wide lane block (shared affine params,
    # as in the PyTorch module).  Stats stay in f32; centered value reused.
    blocks = []
    for e in range(E):
        blk = h[:, e * H:(e + 1) * H]
        mean = jnp.mean(blk, axis=-1, keepdims=True)
        cen = blk - mean
        var = jnp.mean(cen * cen, axis=-1, keepdims=True)
        blocks.append(cen * jax.lax.rsqrt(var + LN_EPS))
    hn = jnp.concatenate(blocks, axis=-1)
    hn = jnp.tanh(hn * ln_w + ln_b)

    # Q hidden layer + ReLU: one MXU pass.
    h2 = jnp.dot(hn.astype(w2_ref.dtype), w2_ref[...],
                 preferred_element_type=f32) + b2
    h2 = jnp.maximum(h2, 0.0)

    # Head: (bt, E*H) @ (E*H, E) block-diagonal -> (bt, E); K is fully used.
    q = jnp.dot(h2.astype(w3_ref.dtype), w3_ref[...],
                preferred_element_type=f32) + b3
    o_ref[...] = q.astype(o_ref.dtype)


def _block_diag(w):
    """(E, Din, Dout) -> (E*Din, E*Dout) block-diagonal."""
    E, di, do = w.shape
    eye = jnp.eye(E, dtype=w.dtype)
    return jnp.einsum("eio,ef->eifo", w, eye).reshape(E * di, E * do)


def pack_params(params, *, matmul_dtype=jnp.bfloat16):
    """One-time parameter prep (do NOT call per forward):
    block-diagonal bf16 weights + a single f32 slab for biases/LayerNorm."""
    E, _, H = params["w2"].shape
    w1_bd = _block_diag(params["w1"]).astype(matmul_dtype)      # (E*Din, E*H)
    w2_bd = _block_diag(params["w2"]).astype(matmul_dtype)      # (E*H,  E*H)
    w3_bd = _block_diag(params["w3"]).astype(matmul_dtype)      # (E*H,  E)

    b1_row = params["b1"].reshape(1, E * H)
    b2_row = params["b2"].reshape(1, E * H)
    lnw_row = jnp.tile(params["ln_w"].reshape(1, H), (1, E))    # shared LN affine
    lnb_row = jnp.tile(params["ln_b"].reshape(1, H), (1, E))
    b3_row = jnp.zeros((1, E * H), jnp.float32).at[0, :E].set(
        params["b3"].reshape(E))
    consts = jnp.concatenate(
        [b1_row, lnw_row, lnb_row, b2_row, b3_row], axis=0).astype(jnp.float32)

    return {"w1": w1_bd, "w2": w2_bd, "w3": w3_bd, "consts": consts}


def vectorized_critics_forward(obs, action, packed, *, batch_tile=256):
    """obs: (E, B, obs_dim), action: (E, B, action_dim) -> Qs: (E, B, 1).

    `packed` comes from pack_params (block-diagonal bf16 weights, f32 consts).
    """
    E, B, Do = obs.shape
    Da = action.shape[-1]
    Din = Do + Da
    EH = packed["w2"].shape[0]
    H = EH // E
    assert packed["w1"].shape == (E * Din, EH)

    # Lane-pack the ensemble: x_p[b, e*Din + i] = concat([obs, act], -1)[e, b, i].
    x_p = (jnp.concatenate([obs, action], axis=-1)
           .swapaxes(0, 1)
           .reshape(B, E * Din)
           .astype(packed["w1"].dtype))

    bt = B if B <= batch_tile else batch_tile
    assert B % bt == 0, "batch must be divisible by the batch tile"

    q = pl.pallas_call(
        functools.partial(_critics_kernel, E, H),
        out_shape=jax.ShapeDtypeStruct((B, E), jnp.float32),
        grid_spec=pltpu.PrefetchScalarGridSpec(
            num_scalar_prefetch=0,
            grid=(B // bt,),
            in_specs=[
                pl.BlockSpec((bt, E * Din), lambda i: (i, 0)),   # packed acts
                pl.BlockSpec((E * Din, EH), lambda i: (0, 0)),   # w1 block-diag
                pl.BlockSpec((EH, EH), lambda i: (0, 0)),        # w2 block-diag
                pl.BlockSpec((EH, E), lambda i: (0, 0)),         # w3 block-diag
                pl.BlockSpec((5, EH), lambda i: (0, 0)),         # bias / LN slab
            ],
            out_specs=pl.BlockSpec((bt, E), lambda i: (i, 0)),
        ),
        compiler_params=pltpu.CompilerParams(
            dimension_semantics=("parallel",)),
    )(x_p, packed["w1"], packed["w2"], packed["w3"], packed["consts"])

    # (B, E) -> (E, B, 1) to match the PyTorch module's output layout.
    return q.T[:, :, None]


def init_params(key, in_dim, hidden_dim, ensemble_size):
    """Deterministic init mirroring VectorizedLinear.reset_parameters shapes/bounds."""
    ks = jax.random.split(key, 6)

    def vlin(kw, kb, fan_in, fan_out):
        bound = 1.0 / math.sqrt(fan_in)              # kaiming_uniform_(a=sqrt(5))
        w = jax.random.uniform(kw, (ensemble_size, fan_in, fan_out),
                               jnp.float32, -bound, bound)
        b = jax.random.uniform(kb, (ensemble_size, 1, fan_out),
                               jnp.float32, -bound, bound)
        return w, b

    w1, b1 = vlin(ks[0], ks[1], in_dim, hidden_dim)
    w2, b2 = vlin(ks[2], ks[3], hidden_dim, hidden_dim)
    w3, b3 = vlin(ks[4], ks[5], hidden_dim, 1)
    return {
        "w1": w1, "b1": b1,
        "ln_w": jnp.ones((1, hidden_dim), jnp.float32),
        "ln_b": jnp.zeros((1, hidden_dim), jnp.float32),
        "w2": w2, "b2": b2,
        "w3": w3, "b3": b3,
    }


def reference_forward(obs, action, params, matmul_dtype=jnp.float32):
    """Pure-JAX reference of the PyTorch forward (obs_type != 'pixels').

    matmul_dtype=float32 reproduces the module exactly; bfloat16 mirrors the
    kernel's recipe (bf16 MXU operands, f32 accumulation, f32 LN/tanh/ReLU).
    """
    f32 = jnp.float32
    x = jnp.concatenate([obs, action], axis=-1).astype(matmul_dtype)
    h = jnp.einsum("ebi,eio->ebo", x, params["w1"].astype(matmul_dtype),
                   preferred_element_type=f32) + params["b1"]
    mean = jnp.mean(h, axis=-1, keepdims=True)
    cen = h - mean
    var = jnp.mean(cen * cen, axis=-1, keepdims=True)
    h = cen * jax.lax.rsqrt(var + LN_EPS)
    h = h * params["ln_w"][None] + params["ln_b"][None]
    h = jnp.tanh(h)
    h2 = jnp.einsum("ebi,eio->ebo", h.astype(matmul_dtype),
                    params["w2"].astype(matmul_dtype),
                    preferred_element_type=f32) + params["b2"]
    h2 = jnp.maximum(h2, 0.0)
    return jnp.einsum("ebi,eio->ebo", h2.astype(matmul_dtype),
                      params["w3"].astype(matmul_dtype),
                      preferred_element_type=f32) + params["b3"]


if __name__ == "__main__":
    # Small shapes consistent with the module (states obs_type).
    E, B = 4, 8
    obs_dim, action_dim, hidden_dim = 17, 6, 32

    key = jax.random.PRNGKey(0)
    k_obs, k_act, k_par = jax.random.split(key, 3)
    obs = jax.random.normal(k_obs, (E, B, obs_dim), jnp.float32)
    action = jax.random.normal(k_act, (E, B, action_dim), jnp.float32)
    params = init_params(k_par, obs_dim + action_dim, hidden_dim, E)
    packed = pack_params(params)     # one-time weight prep (block-diag bf16)

    qs = vectorized_critics_forward(obs, action, packed)
    qs = jax.block_until_ready(qs)
    assert qs.shape == (E, B, 1), qs.shape

    # Tight check vs. a reference using the same bf16-operand / f32-accumulate recipe.
    ref_bf16 = reference_forward(obs, action, params, matmul_dtype=jnp.bfloat16)
    err_bf16 = float(jnp.max(jnp.abs(qs - ref_bf16)))
    assert jnp.allclose(qs, ref_bf16, atol=2e-3, rtol=2e-3), err_bf16

    # Loose sanity check vs. the exact f32 forward of the PyTorch module.
    ref_f32 = reference_forward(obs, action, params, matmul_dtype=jnp.float32)
    err_f32 = float(jnp.max(jnp.abs(qs - ref_f32)))
    assert jnp.allclose(qs, ref_f32, atol=1e-1, rtol=1e-1), err_f32

    print("KERNEL_OK")
</pallas_src>

<mosaic_0001>
module attributes {stable_mosaic.version = 11 : i64} {
  func.func @_critics_kernel(%arg0: i32, %arg1: memref<8x92xbf16, #tpu.memory_space<vmem>>, %arg2: memref<92x128xbf16, #tpu.memory_space<vmem>>, %arg3: memref<128x128xbf16, #tpu.memory_space<vmem>>, %arg4: memref<128x4xbf16, #tpu.memory_space<vmem>>, %arg5: memref<5x128xf32, #tpu.memory_space<vmem>>, %arg6: memref<8x4xf32, #tpu.memory_space<vmem>>) attributes {dimension_semantics = [#tpu.dimension_semantics<parallel>], iteration_bounds = array<i64: 1>, scalar_prefetch = 0 : i64, scratch_operands = 0 : i64, tpu.core_type = #tpu.core_type<tc>, window_params = [{transform_indices = @transform_0, window_bounds = array<i64: 8, 92>}, {pipeline_mode = #tpu.pipeline_mode<synchronous>, transform_indices = @transform_1, window_bounds = array<i64: 92, 128>}, {pipeline_mode = #tpu.pipeline_mode<synchronous>, transform_indices = @transform_2, window_bounds = array<i64: 128, 128>}, {pipeline_mode = #tpu.pipeline_mode<synchronous>, transform_indices = @transform_3, window_bounds = array<i64: 128, 4>}, {pipeline_mode = #tpu.pipeline_mode<synchronous>, transform_indices = @transform_4, window_bounds = array<i64: 5, 128>}, {transform_indices = @transform_5, window_bounds = array<i64: 8, 4>}]} {
    %c0 = arith.constant 0 : index
    %c0_0 = arith.constant 0 : index
    %0 = vector.load %arg5[%c0, %c0_0] : memref<5x128xf32, #tpu.memory_space<vmem>>, vector<1x128xf32>
    %c1 = arith.constant 1 : index
    %c0_1 = arith.constant 0 : index
    %1 = vector.load %arg5[%c1, %c0_1] : memref<5x128xf32, #tpu.memory_space<vmem>>, vector<1x128xf32>
    %c2 = arith.constant 2 : index
    %c0_2 = arith.constant 0 : index
    %2 = vector.load %arg5[%c2, %c0_2] : memref<5x128xf32, #tpu.memory_space<vmem>>, vector<1x128xf32>
    %c3 = arith.constant 3 : index
    %c0_3 = arith.constant 0 : index
    %3 = vector.load %arg5[%c3, %c0_3] : memref<5x128xf32, #tpu.memory_space<vmem>>, vector<1x128xf32>
    %c4 = arith.constant 4 : index
    %c0_4 = arith.constant 0 : index
    %4 = vector.load %arg5[%c4, %c0_4] : memref<5x128xf32, #tpu.memory_space<vmem>>, vector<1x4xf32>
    %c0_5 = arith.constant 0 : index
    %c0_6 = arith.constant 0 : index
    %5 = vector.load %arg1[%c0_5, %c0_6] : memref<8x92xbf16, #tpu.memory_space<vmem>>, vector<8x92xbf16>
    %c0_7 = arith.constant 0 : index
    %c0_8 = arith.constant 0 : index
    %6 = vector.load %arg2[%c0_7, %c0_8] : memref<92x128xbf16, #tpu.memory_space<vmem>>, vector<92x128xbf16>
    %cst = arith.constant dense<0.000000e+00> : vector<8x128xf32>
    %7 = tpu.matmul %5, %6, %cst {dimension_numbers = #tpu.dot_dimension_numbers<[1], [0], [0], [1], [0, 0, 1, 1], [], []>} : vector<8x92xbf16>, vector<92x128xbf16>, vector<8x128xf32> -> vector<8x128xf32>
    %8 = vector.broadcast %0 : vector<1x128xf32> to vector<8x128xf32>
    %9 = arith.addf %7, %8 : vector<8x128xf32>
    %10 = vector.extract_strided_slice %9 {offsets = [0, 0], sizes = [8, 32], strides = [1, 1]} : vector<8x128xf32> to vector<8x32xf32>
    %cst_9 = arith.constant dense<0.000000e+00> : vector<8xf32>
    %11 = vector.multi_reduction <add>, %10, %cst_9 [1] : vector<8x32xf32> to vector<8xf32>
    %12 = vector.shape_cast %11 : vector<8xf32> to vector<8x1xf32>
    %cst_10 = arith.constant 3.200000e+01 : f32
    %13 = vector.broadcast %cst_10 : f32 to vector<8x1xf32>
    %14 = arith.divf %12, %13 : vector<8x1xf32>
    %15 = vector.broadcast %14 : vector<8x1xf32> to vector<8x32xf32>
    %16 = arith.subf %10, %15 : vector<8x32xf32>
    %17 = arith.mulf %16, %16 : vector<8x32xf32>
    %cst_11 = arith.constant dense<0.000000e+00> : vector<8xf32>
    %18 = vector.multi_reduction <add>, %17, %cst_11 [1] : vector<8x32xf32> to vector<8xf32>
    %19 = vector.shape_cast %18 : vector<8xf32> to vector<8x1xf32>
    %cst_12 = arith.constant 3.200000e+01 : f32
    %20 = vector.broadcast %cst_12 : f32 to vector<8x1xf32>
    %21 = arith.divf %19, %20 : vector<8x1xf32>
    %cst_13 = arith.constant 9.99999974E-6 : f32
    %22 = vector.broadcast %cst_13 : f32 to vector<8x1xf32>
    %23 = arith.addf %21, %22 : vector<8x1xf32>
    %24 = math.rsqrt %23 : vector<8x1xf32>
    %25 = vector.broadcast %24 : vector<8x1xf32> to vector<8x32xf32>
    %26 = arith.mulf %16, %25 : vector<8x32xf32>
    %27 = vector.extract_strided_slice %9 {offsets = [0, 32], sizes = [8, 32], strides = [1, 1]} : vector<8x128xf32> to vector<8x32xf32>
    %cst_14 = arith.constant dense<0.000000e+00> : vector<8xf32>
    %28 = vector.multi_reduction <add>, %27, %cst_14 [1] : vector<8x32xf32> to vector<8xf32>
    %29 = vector.shape_cast %28 : vector<8xf32> to vector<8x1xf32>
    %cst_15 = arith.constant 3.200000e+01 : f32
    %30 = vector.broadcast %cst_15 : f32 to vector<8x1xf32>
    %31 = arith.divf %29, %30 : vector<8x1xf32>
    %32 = vector.broadcast %31 : vector<8x1xf32> to vector<8x32xf32>
    %33 = arith.subf %27, %32 : vector<8x32xf32>
    %34 = arith.mulf %33, %33 : vector<8x32xf32>
    %cst_16 = arith.constant dense<0.000000e+00> : vector<8xf32>
    %35 = vector.multi_reduction <add>, %34, %cst_16 [1] : vector<8x32xf32> to vector<8xf32>
    %36 = vector.shape_cast %35 : vector<8xf32> to vector<8x1xf32>
    %cst_17 = arith.constant 3.200000e+01 : f32
    %37 = vector.broadcast %cst_17 : f32 to vector<8x1xf32>
    %38 = arith.divf %36, %37 : vector<8x1xf32>
    %cst_18 = arith.constant 9.99999974E-6 : f32
    %39 = vector.broadcast %cst_18 : f32 to vector<8x1xf32>
    %40 = arith.addf %38, %39 : vector<8x1xf32>
    %41 = math.rsqrt %40 : vector<8x1xf32>
    %42 = vector.broadcast %41 : vector<8x1xf32> to vector<8x32xf32>
    %43 = arith.mulf %33, %42 : vector<8x32xf32>
    %44 = vector.extract_strided_slice %9 {offsets = [0, 64], sizes = [8, 32], strides = [1, 1]} : vector<8x128xf32> to vector<8x32xf32>
    %cst_19 = arith.constant dense<0.000000e+00> : vector<8xf32>
    %45 = vector.multi_reduction <add>, %44, %cst_19 [1] : vector<8x32xf32> to vector<8xf32>
    %46 = vector.shape_cast %45 : vector<8xf32> to vector<8x1xf32>
    %cst_20 = arith.constant 3.200000e+01 : f32
    %47 = vector.broadcast %cst_20 : f32 to vector<8x1xf32>
    %48 = arith.divf %46, %47 : vector<8x1xf32>
    %49 = vector.broadcast %48 : vector<8x1xf32> to vector<8x32xf32>
    %50 = arith.subf %44, %49 : vector<8x32xf32>
    %51 = arith.mulf %50, %50 : vector<8x32xf32>
    %cst_21 = arith.constant dense<0.000000e+00> : vector<8xf32>
    %52 = vector.multi_reduction <add>, %51, %cst_21 [1] : vector<8x32xf32> to vector<8xf32>
    %53 = vector.shape_cast %52 : vector<8xf32> to vector<8x1xf32>
    %cst_22 = arith.constant 3.200000e+01 : f32
    %54 = vector.broadcast %cst_22 : f32 to vector<8x1xf32>
    %55 = arith.divf %53, %54 : vector<8x1xf32>
    %cst_23 = arith.constant 9.99999974E-6 : f32
    %56 = vector.broadcast %cst_23 : f32 to vector<8x1xf32>
    %57 = arith.addf %55, %56 : vector<8x1xf32>
    %58 = math.rsqrt %57 : vector<8x1xf32>
    %59 = vector.broadcast %58 : vector<8x1xf32> to vector<8x32xf32>
    %60 = arith.mulf %50, %59 : vector<8x32xf32>
    %61 = vector.extract_strided_slice %9 {offsets = [0, 96], sizes = [8, 32], strides = [1, 1]} : vector<8x128xf32> to vector<8x32xf32>
    %cst_24 = arith.constant dense<0.000000e+00> : vector<8xf32>
    %62 = vector.multi_reduction <add>, %61, %cst_24 [1] : vector<8x32xf32> to vector<8xf32>
    %63 = vector.shape_cast %62 : vector<8xf32> to vector<8x1xf32>
    %cst_25 = arith.constant 3.200000e+01 : f32
    %64 = vector.broadcast %cst_25 : f32 to vector<8x1xf32>
    %65 = arith.divf %63, %64 : vector<8x1xf32>
    %66 = vector.broadcast %65 : vector<8x1xf32> to vector<8x32xf32>
    %67 = arith.subf %61, %66 : vector<8x32xf32>
    %68 = arith.mulf %67, %67 : vector<8x32xf32>
    %cst_26 = arith.constant dense<0.000000e+00> : vector<8xf32>
    %69 = vector.multi_reduction <add>, %68, %cst_26 [1] : vector<8x32xf32> to vector<8xf32>
    %70 = vector.shape_cast %69 : vector<8xf32> to vector<8x1xf32>
    %cst_27 = arith.constant 3.200000e+01 : f32
    %71 = vector.broadcast %cst_27 : f32 to vector<8x1xf32>
    %72 = arith.divf %70, %71 : vector<8x1xf32>
    %cst_28 = arith.constant 9.99999974E-6 : f32
    %73 = vector.broadcast %cst_28 : f32 to vector<8x1xf32>
    %74 = arith.addf %72, %73 : vector<8x1xf32>
    %75 = math.rsqrt %74 : vector<8x1xf32>
    %76 = vector.broadcast %75 : vector<8x1xf32> to vector<8x32xf32>
    %77 = arith.mulf %67, %76 : vector<8x32xf32>
    %78 = tpu.concatenate %26, %43, %60, %77 in 1 : vector<8x32xf32>, vector<8x32xf32>, vector<8x32xf32>, vector<8x32xf32> -> vector<8x128xf32>
    %79 = vector.broadcast %1 : vector<1x128xf32> to vector<8x128xf32>
    %80 = arith.mulf %78, %79 : vector<8x128xf32>
    %81 = vector.broadcast %2 : vector<1x128xf32> to vector<8x128xf32>
    %82 = arith.addf %80, %81 : vector<8x128xf32>
    %83 = math.tanh %82 : vector<8x128xf32>
    %84 = arith.truncf %83 : vector<8x128xf32> to vector<8x128xbf16>
    %c0_29 = arith.constant 0 : index
    %c0_30 = arith.constant 0 : index
    %85 = vector.load %arg3[%c0_29, %c0_30] : memref<128x128xbf16, #tpu.memory_space<vmem>>, vector<128x128xbf16>
    %cst_31 = arith.constant dense<0.000000e+00> : vector<8x128xf32>
    %86 = tpu.matmul %84, %85, %cst_31 {dimension_numbers = #tpu.dot_dimension_numbers<[1], [0], [0], [1], [0, 0, 1, 1], [], []>} : vector<8x128xbf16>, vector<128x128xbf16>, vector<8x128xf32> -> vector<8x128xf32>
    %87 = vector.broadcast %3 : vector<1x128xf32> to vector<8x128xf32>
    %88 = arith.addf %86, %87 : vector<8x128xf32>
    %cst_32 = arith.constant 0.000000e+00 : f32
    %89 = vector.broadcast %cst_32 : f32 to vector<8x128xf32>
    %90 = arith.maximumf %88, %89 : vector<8x128xf32>
    %91 = arith.truncf %90 : vector<8x128xf32> to vector<8x128xbf16>
    %c0_33 = arith.constant 0 : index
    %c0_34 = arith.constant 0 : index
    %92 = vector.load %arg4[%c0_33, %c0_34] : memref<128x4xbf16, #tpu.memory_space<vmem>>, vector<128x4xbf16>
    %cst_35 = arith.constant dense<0.000000e+00> : vector<8x4xf32>
    %93 = tpu.matmul %91, %92, %cst_35 {dimension_numbers = #tpu.dot_dimension_numbers<[1], [0], [0], [1], [0, 0, 1, 1], [], []>} : vector<8x128xbf16>, vector<128x4xbf16>, vector<8x4xf32> -> vector<8x4xf32>
    %94 = vector.broadcast %4 : vector<1x4xf32> to vector<8x4xf32>
    %95 = arith.addf %93, %94 : vector<8x4xf32>
    %c0_36 = arith.constant 0 : index
    %c0_37 = arith.constant 0 : index
    %96 = vector.load %arg6[%c0_36, %c0_37] : memref<8x4xf32, #tpu.memory_space<vmem>>, vector<8x4xf32>
    tpu.vector_store %arg6[%c0_36, %c0_37], %95 {strides = array<i32>} : memref<8x4xf32, #tpu.memory_space<vmem>>, vector<8x4xf32>,
    return
  }
  func.func @transform_0(%arg0: i32) -> (i32, i32) {
    %c0_i32 = arith.constant 0 : i32
    %c0_i32_0 = arith.constant 0 : i32
    return %arg0, %c0_i32 : i32, i32
  }
  func.func @transform_1(%arg0: i32) -> (i32, i32) {
    %c0_i32 = arith.constant 0 : i32
    %c0_i32_0 = arith.constant 0 : i32
    %c0_i32_1 = arith.constant 0 : i32
    return %c0_i32, %c0_i32_0 : i32, i32
  }
  func.func @transform_2(%arg0: i32) -> (i32, i32) {
    %c0_i32 = arith.constant 0 : i32
    %c0_i32_0 = arith.constant 0 : i32
    %c0_i32_1 = arith.constant 0 : i32
    return %c0_i32, %c0_i32_0 : i32, i32
  }
  func.func @transform_3(%arg0: i32) -> (i32, i32) {
    %c0_i32 = arith.constant 0 : i32
    %c0_i32_0 = arith.constant 0 : i32
    %c0_i32_1 = arith.constant 0 : i32
    return %c0_i32, %c0_i32_0 : i32, i32
  }
  func.func @transform_4(%arg0: i32) -> (i32, i32) {
    %c0_i32 = arith.constant 0 : i32
    %c0_i32_0 = arith.constant 0 : i32
    %c0_i32_1 = arith.constant 0 : i32
    return %c0_i32, %c0_i32_0 : i32, i32
  }
  func.func @transform_5(%arg0: i32) -> (i32, i32) {
    %c0_i32 = arith.constant 0 : i32
    %c0_i32_0 = arith.constant 0 : i32
    return %arg0, %c0_i32 : i32, i32
  }
}

</mosaic_0001>

<bundles_post_ra>
// kernel: tpu_custom_call.1
= control target key start
LH: loop header
LB: loop body
LE: loop exit
PB: predicated region body
PF: predicated region fallthrough
CT: control target
= control target key end

     0   :  { %10 = vsyncpa [#allocation3], 0  ;;  %s791_s0 = inlined_call_operand.hbm [shape: bf16[8,92], index: 0, kind: input, shape index: {}]   ;;  %s792_s1 = inlined_call_operand.hbm [shape: bf16[92,128], index: 1, kind: input, shape index: {}]   ;;  %s793_s2 = inlined_call_operand.vmem [shape: bf16[128,128], index: 2, kind: input, shape index: {}]   ;;  %s794_s3 = inlined_call_operand.vmem [shape: bf16[128,4], index: 3, kind: input, shape index: {}]   ;;  %s795_s4 = inlined_call_operand.hbm [shape: f32[5,128], index: 4, kind: input, shape index: {}]   ;;  %s796_s5 = inlined_call_operand.vmem [shape: f32[8,4], index: 5, kind: output, shape index: {}]  }
   0x1   :  { %11 = vsyncpa [#allocation5], 0  ;;  %s27_s20 = sshll.u32 %s792_s1, 4  ;;  %s646_s21 = smov [#allocation4]   ;;  %s28_s20 = int_to_ptr.hbm [resolvable:$true] %s27_s20 }
   0x2   :  { %s29_s22 = sshll.u32 %s646_s21, 4  ;;  %s17_s25 = sshll.u32 %s791_s0, 4  ;;  %s30_s22 = int_to_ptr.vmem [resolvable:$true] %s29_s22  ;;  %s18_s25 = int_to_ptr.hbm [resolvable:$true] %s17_s25 }
   0x3   :  { %s647_s26 = smov 64   ;;  %s648_s27 = smov 4  }
   0x4   :  { %35 = dma.hbm_to_vmem [thread:$0]  %s28_s20, 768, %s30_s22, [#allocation5], %s647_s26, %s647_s26, %s648_s27  }
   0x5   :  { %s649_s28 = smov [#allocation2]   ;;  %s45_s1 = sshll.u32 %s795_s4, 4  ;;  %s46_s1 = int_to_ptr.hbm [resolvable:$true] %s45_s1 }
   0x6   :  { %s19_s29 = sshll.u32 %s649_s28, 4  ;;  %s650_s7 = smov [#allocation6]   ;;  %s20_s29 = int_to_ptr.vmem [resolvable:$true] %s19_s29 }
   0x7   :  { %22 = dma.hbm_to_vmem [thread:$0]  %s18_s25, 64, %s20_s29, [#allocation3]  }
   0x8   :  { %s47_s8 = sshll.u32 %s650_s7, 4  ;;  %s48_s8 = int_to_ptr.vmem [resolvable:$true] %s47_s8 }
   0x9   :  { %50 = dma.hbm_to_vmem [thread:$0]  %s46_s1, 128, %s48_s8, [#allocation5]  }
   0xa   :  { %642 = dma.done.wait [#allocation3], 64  }
   0xb   :  { %643 = vsyncadd [#allocation3], 4294967232 }
   0xc   :  { %644 = dma.done.wait [#allocation5], 896  }
   0xd   :  { %645 = vsyncadd [#allocation5], 4294966400  ;;  %v456_v0 = vld [vmem:[#allocation4 + $0x28] sm:$0xf]  ;;  %v528_v1 = vld [vmem:[#allocation4 + $0x28] sm:$0x30] }
   0xe   :  { %vm122_vm0 = vcmask 1045504   ;;  %v457_v2 = vor.u32 %v528_v1, %v456_v0  ;;  %v527_v4 = vld [vmem:[#allocation4 + $0x20] sm:$0xff]  ;;  %v526_v5 = vld [vmem:[#allocation4 + $0x18] sm:$0xff]  ;;  %v525_v6 = vld [vmem:[#allocation4 + $0x10] sm:$0xff]  ;;  %vm118_vm1 = vcmask 752640   ;;  %s651_s0 = smov 32  }
   0xf   :  { %v524_v7 = vld [vmem:[#allocation4 + $0x8] sm:$0xff]  ;;  %v523_v8 = vld [vmem:[#allocation4] sm:$0xff]  ;;  %v69_v9 = vld [vmem:[#allocation2] sm:$0xf]  ;;  %s652_s4 = smov 96   ;;  %vm139_vm2 = vcmask 261120  }
  0x10   :  { %v124_v3 = vsel %vm122_vm0, %v457_v2, 0  ;;  %v553_v10 = vld [vmem:[#allocation6] ss:$0 sm:$0xff]  ;;  %v653_v21 = vmov 32.0   ;;  %v536_v51 = vld [vmem:[%s793_s2 + $0x38] sm:$0xff]  ;;  %v534_v55 = vld [vmem:[%s793_s2 + $0x28] sm:$0xff] }
  0x11   :  { %128 = vmatpush.bf16.msra.mxu0 %v124_v3  ;;  %558 = vrcp.f32 %v653_v21  ;;  %333 = vmatpush.bf16.msra.mxu1 %v536_v51  ;;  %v535_v53 = vld [vmem:[%s793_s2 + $0x30] sm:$0xff]  ;;  %v533_v59 = vld [vmem:[%s793_s2 + $0x20] sm:$0xff]  ;;  %v532_v61 = vld [vmem:[%s793_s2 + $0x18] sm:$0xff]  ;;  %vm258_vm0 = vcmask 523264  }
  0x12   :  { %v531_v63 = vld [vmem:[%s793_s2 + $0x10] sm:$0xff] }
  0x13   :  { %v543_v21 = vld [vmem:[%s794_s3 + $0x30] sm:$0xff] }
  0x15   :  { %129 = vmatpush.bf16.msra.mxu0 %v527_v4  ;;  %334 = vmatpush.bf16.msra.mxu1 %v535_v53 }
  0x17   :  { %v559_v22 = vpop.eup %558 }
  0x18   :  { %v144_v23 = vmul.f32 32.0, %v559_v22  ;;  %vm148_vm3 = vweird.f32 %v559_v22 }
  0x19   :  { %130 = vmatpush.bf16.msra.mxu0 %v526_v5  ;;  %335 = vmatpush.bf16.msra.mxu1 %v534_v55  ;;  %v530_v5 = vld [vmem:[%s793_s2 + $0x8] sm:$0xff]  ;;  %v537_v55 = vld [vmem:[%s794_s3] sm:$0xff] }
  0x1a   :  { %v145_v24 = vsub.f32 1.0, %v144_v23 }
  0x1c   :  { %v146_v25 = vmul.f32 %v559_v22, %v145_v24 }
  0x1d   :  { %131 = vmatpush.bf16.msra.mxu0 %v525_v6  ;;  %336 = vmatpush.bf16.msra.mxu1 %v533_v59 }
  0x1e   :  { %v147_v26 = vadd.f32 %v559_v22, %v146_v25 }
  0x20   :  { %v702_v27 = vsel %vm148_vm3, %v559_v22, %v147_v26 }
  0x21   :  { %132 = vmatpush.bf16.msra.mxu0 %v524_v7  ;;  %337 = vmatpush.bf16.msra.mxu1 %v532_v61 }
  0x25   :  { %133 = vmatpush.bf16.msra.mxu0 %v523_v8  ;;  %338 = vmatpush.bf16.msra.mxu1 %v531_v63 }
  0x28   :  { %458 = vmatmul.msk.bf16.vlgmr.msra.gmra.mxu0 %vm118_vm1, %v69_v9  ;;  %v529_v9 = vld [vmem:[%s793_s2] sm:$0xff]  ;;  %vm260_vm1 = vcmask 785408  }
  0x29   :  { %339 = vmatpush.bf16.msra.mxu1 %v530_v5 }
  0x2d   :  { %340 = vmatpush.bf16.msra.mxu1 %v529_v9 }
  0xa5   :  { %v135_v11 = vpop.f32.mrf.mxu0 }
  0xa6   :  { %v136_v12 = vadd.f32 %v553_v10, %v135_v11 }
  0xa8   :  { %228 = vrot.lane.b32.xlu1 %v136_v12, %s651_s0  ;;  %170 = vrot.lane.b32.xlu0 %v136_v12, %s652_s4  ;;  %v140_v14 = vsel %vm139_vm2, %v136_v12, 0.0 }
  0xad   :  { %v137_v13 = vpop.f32.mrf.mxu0 }
  0xb0   :  { %199 = vrot.lane.b32.xlu0 %v136_v12, %s647_s26 }
  0xda   :  { %141 = vadd.xlane.f32.xlu0 %v140_v14 }
 0x11a   :  { %v171_v15 = vpop.permute.xlu0 %170  ;;  %v229_v19 = vpop.permute.xlu1 %228 }
 0x11b   :  { %v173_v16 = vsel %vm139_vm2, %v171_v15, 0.0  ;;  %v231_v20 = vsel %vm139_vm2, %v229_v19, 0.0 }
 0x11c   :  { %174 = vadd.xlane.f32.xlu1 %v173_v16 }
 0x122   :  { %v200_v17 = vpop.permute.xlu0 %199 }
 0x123   :  { %v202_v18 = vsel %vm139_vm2, %v200_v17, 0.0 }
 0x124   :  { %203 = vadd.xlane.f32.xlu2 %v202_v18  ;;  %v544_v18 = vld [vmem:[%s794_s3 + $0x38] sm:$0xff] }
 0x125   :  { %413 = vmatpush.bf16.msra.mxu2 %v544_v18 }
 0x129   :  { %414 = vmatpush.bf16.msra.mxu2 %v543_v21 }
 0x12c   :  { %232 = vadd.xlane.f32.xlu2 %v231_v20 }
 0x14d   :  { %v142_v28 = vpop.xlane.xlu0 %141 }
 0x14e   :  { %v150_v29 = vmul.f32 %v702_v27, %v142_v28  ;;  %v542_v28 = vld [vmem:[%s794_s3 + $0x28] sm:$0xff] }
 0x14f   :  { %415 = vmatpush.bf16.msra.mxu2 %v542_v28 }
 0x150   :  { %v705_v30 = vsub.f32 %v136_v12, %v150_v29 }
 0x152   :  { %v152_v31 = vmul.f32 %v705_v30, %v705_v30 }
 0x154   :  { %v153_v32 = vsel %vm139_vm2, %v152_v31, 0.0 }
 0x155   :  { %154 = vadd.xlane.f32.xlu1 %v153_v32 }
 0x18f   :  { %v175_v33 = vpop.xlane.xlu1 %174 }
 0x190   :  { %v176_v34 = vmul.f32 %v175_v33, %v702_v27 }
 0x192   :  { %v711_v35 = vsub.f32 %v136_v12, %v176_v34 }
 0x194   :  { %v178_v36 = vmul.f32 %v711_v35, %v711_v35 }
 0x196   :  { %180 = vrot.lane.b32.xlu2 %v178_v36, %s652_s4  ;;  %v541_v36 = vld [vmem:[%s794_s3 + $0x20] sm:$0xff] }
 0x197   :  { %v204_v37 = vpop.xlane.xlu2 %203  ;;  %416 = vmatpush.bf16.msra.mxu2 %v541_v36 }
 0x198   :  { %v205_v38 = vmul.f32 %v204_v37, %v702_v27 }
 0x19a   :  { %v717_v39 = vsub.f32 %v136_v12, %v205_v38 }
 0x19c   :  { %v207_v40 = vmul.f32 %v717_v39, %v717_v39 }
 0x19e   :  { %209 = vrot.lane.b32.xlu2 %v207_v40, %s647_s26 }
 0x19f   :  { %v233_v41 = vpop.xlane.xlu2 %232 }
 0x1a0   :  { %v234_v42 = vmul.f32 %v233_v41, %v702_v27 }
 0x1a2   :  { %v723_v43 = vsub.f32 %v136_v12, %v234_v42 }
 0x1a4   :  { %v236_v44 = vmul.f32 %v723_v43, %v723_v43 }
 0x1a6   :  { %238 = vrot.lane.b32.xlu2 %v236_v44, %s651_s0 }
 0x1c8   :  { %v155_v52 = vpop.xlane.xlu1 %154 }
 0x1c9   :  { %v156_v54 = vmul.f32 %v155_v52, %v702_v27 }
 0x1cb   :  { %v157_v56 = vadd.f32 1e-05, %v156_v54 }
 0x1cd   :  { %560 = vrsqrt.f32 %v157_v56  ;;  %vm164_vm10 = vweird.f32 %v157_v56 }
 0x1d3   :  { %v561_v1 = vpop.eup %560 }
 0x1d4   :  { %v159_v6 = vmul.f32 %v561_v1, %v157_v56  ;;  %vm165_vm6 = vweird.f32 %v561_v1  ;;  %v556_v56 = vld [vmem:[#allocation6 + $0x3] ss:$0 sm:$0xff] }
 0x1d5   :  { %vm166_vm12 = vmor %vm164_vm10, %vm165_vm6 }
 0x1d6   :  { %v160_v11 = vmul.f32 %v561_v1, %v159_v6 }
 0x1d8   :  { %v161_v16 = vmul.f32 0.5, %v160_v11 }
 0x1da   :  { %v162_v22 = vsub.f32 1.5, %v161_v16 }
 0x1dc   :  { %v163_v29 = vmul.f32 %v561_v1, %v162_v22 }
 0x1de   :  { %v167_v37 = vsel %vm166_vm12, %v561_v1, %v163_v29 }
 0x1df   :  { %v168_v44 = vmul.f32 %v167_v37, %v705_v30  ;;  %v539_v30 = vld [vmem:[%s794_s3 + $0x10] sm:$0xff] }
 0x1f0   :  { %v181_v45 = vpop.permute.xlu2 %180 }
 0x1f1   :  { %v183_v46 = vsel %vm139_vm2, %v181_v45, 0.0  ;;  %v540_v45 = vld [vmem:[%s794_s3 + $0x18] sm:$0xff] }
 0x1f2   :  { %184 = vadd.xlane.f32.xlu2 %v183_v46  ;;  %417 = vmatpush.bf16.msra.mxu2 %v540_v45 }
 0x1f6   :  { %418 = vmatpush.bf16.msra.mxu2 %v539_v30 }
 0x1f8   :  { %v210_v47 = vpop.permute.xlu2 %209 }
 0x1f9   :  { %v212_v48 = vsel %vm139_vm2, %v210_v47, 0.0  ;;  %v554_v47 = vld [vmem:[#allocation6 + $0x1] ss:$0 sm:$0xff] }
 0x1fa   :  { %213 = vadd.xlane.f32.xlu0 %v212_v48 }
 0x200   :  { %v239_v49 = vpop.permute.xlu2 %238 }
 0x201   :  { %v241_v50 = vsel %vm139_vm2, %v239_v49, 0.0 }
 0x202   :  { %242 = vadd.xlane.f32.xlu1 %v241_v50 }
 0x265   :  { %v185_v57 = vpop.xlane.xlu2 %184 }
 0x266   :  { %v186_v58 = vmul.f32 %v185_v57, %v702_v27 }
 0x268   :  { %v187_v60 = vadd.f32 1e-05, %v186_v58 }
 0x26a   :  { %562 = vrsqrt.f32 %v187_v60  ;;  %vm194_vm7 = vweird.f32 %v187_v60 }
 0x26d   :  { %v214_v62 = vpop.xlane.xlu0 %213 }
 0x26e   :  { %v215_v0 = vmul.f32 %v214_v62, %v702_v27  ;;  %v557_v62 = vld [vmem:[#allocation6 + $0x4] ss:$0 sm:$0xff] }
 0x270   :  { %v563_v2 = vpop.eup %562  ;;  %v216_v3 = vadd.f32 1e-05, %v215_v0 }
 0x271   :  { %v189_v4 = vmul.f32 %v563_v2, %v187_v60  ;;  %vm195_vm4 = vweird.f32 %v563_v2 }
 0x272   :  { %564 = vrsqrt.f32 %v216_v3  ;;  %vm196_vm8 = vmor %vm194_vm7, %vm195_vm4  ;;  %vm223_vm9 = vweird.f32 %v216_v3 }
 0x273   :  { %v190_v7 = vmul.f32 %v563_v2, %v189_v4 }
 0x275   :  { %v243_v8 = vpop.xlane.xlu1 %242  ;;  %v191_v14 = vmul.f32 0.5, %v190_v7 }
 0x276   :  { %v244_v10 = vmul.f32 %v243_v8, %v702_v27 }
 0x277   :  { %v192_v19 = vsub.f32 1.5, %v191_v14 }
 0x278   :  { %v565_v12 = vpop.eup %564  ;;  %v245_v13 = vadd.f32 1e-05, %v244_v10 }
 0x279   :  { %v218_v15 = vmul.f32 %v565_v12, %v216_v3  ;;  %v193_v25 = vmul.f32 %v563_v2, %v192_v19  ;;  %vm224_vm5 = vweird.f32 %v565_v12 }
 0x27a   :  { %566 = vrsqrt.f32 %v245_v13  ;;  %vm225_vm11 = vmor %vm223_vm9, %vm224_vm5  ;;  %vm252_vm14 = vweird.f32 %v245_v13 }
 0x27b   :  { %v219_v17 = vmul.f32 %v565_v12, %v218_v15  ;;  %v197_v32 = vsel %vm196_vm8, %v563_v2, %v193_v25 }
 0x27c   :  { %v198_v40 = vmul.f32 %v197_v32, %v711_v35 }
 0x27d   :  { %v220_v20 = vmul.f32 0.5, %v219_v17 }
 0x27e   :  { %v257_v35 = vsel %vm139_vm2, %v168_v44, %v198_v40  ;;  %vm426_vm2 = vcmask 31744  }
 0x27f   :  { %v221_v23 = vsub.f32 1.5, %v220_v20 }
 0x280   :  { %v567_v24 = vpop.eup %566 }
 0x281   :  { %v247_v26 = vmul.f32 %v567_v24, %v245_v13  ;;  %v222_v27 = vmul.f32 %v565_v12, %v221_v23  ;;  %vm253_vm13 = vweird.f32 %v567_v24 }
 0x282   :  { %vm254_vm15 = vmor %vm252_vm14, %vm253_vm13 }
 0x283   :  { %v248_v31 = vmul.f32 %v567_v24, %v247_v26  ;;  %v226_v34 = vsel %vm225_vm11, %v565_v12, %v222_v27 }
 0x284   :  { %v227_v41 = vmul.f32 %v226_v34, %v717_v39  ;;  %v555_v39 = vld [vmem:[#allocation6 + $0x2] ss:$0 sm:$0xff] }
 0x285   :  { %v249_v33 = vmul.f32 0.5, %v248_v31 }
 0x286   :  { %v259_v49 = vsel %vm258_vm0, %v257_v35, %v227_v41 }
 0x287   :  { %v250_v38 = vsub.f32 1.5, %v249_v33 }
 0x289   :  { %v251_v42 = vmul.f32 %v567_v24, %v250_v38 }
 0x28b   :  { %v255_v46 = vsel %vm254_vm15, %v567_v24, %v251_v42 }
 0x28c   :  { %v256_v48 = vmul.f32 %v255_v46, %v723_v43  ;;  %v538_v43 = vld [vmem:[%s794_s3 + $0x8] sm:$0xff] }
 0x28d   :  { %419 = vmatpush.bf16.msra.mxu2 %v538_v43 }
 0x28e   :  { %v261_v50 = vsel %vm260_vm1, %v259_v49, %v256_v48 }
 0x28f   :  { %v263_v51 = vmul.f32 %v554_v47, %v261_v50 }
 0x291   :  { %v265_v52 = vadd.f32 %v555_v39, %v263_v51  ;;  %420 = vmatpush.bf16.msra.mxu2 %v537_v55 }
 0x293   :  { %568 = vtanh.f32 %v265_v52 }
 0x299   :  { %v569_v53 = vpop.eup %568 }
 0x29a   :  { %v267_v54 = vpack.c.bf16 %v569_v53, %v569_v53 }
 0x29c   :  { %341 = vmatmul.bf16.vlgmr.msra.gmra.mxu1 %v267_v54 }
 0x319   :  { %v342_v57 = vpop.f32.mrf.mxu1 }
 0x31a   :  { %v343_v58 = vadd.f32 %v556_v56, %v342_v57 }
 0x31c   :  { %v346_v59 = vmax.f32 %v343_v58, 0.0 }
 0x31e   :  { %v347_v60 = vpack.c.bf16 %v346_v59, %v346_v59 }
 0x320   :  { %421 = vmatmul.bf16.vlgmr.msra.gmra.mxu2 %v347_v60 }
 0x321   :  { %v344_v61 = vpop.f32.mrf.mxu1 }
 0x3a3   :  { %v422_v63 = vpop.f32.mrf.mxu2 }
 0x3a4   :  { %v423_v0 = vadd.f32 %v557_v62, %v422_v63 }
 0x3a6   :  { %427 = vst.msk [vmem:[%s796_s5] sm:$0xff] %vm426_vm2, %v423_v0 }
 0x3ab   :  { %v424_v1 = vpop.f32.mrf.mxu2 }
 0x3ac   :  { %432 = vsyncpa [#allocation3], 1 }
 0x3ad   :  { %433 = vsyncpa [#allocation5], 1 }

</bundles_post_ra>
